<compile_context>
chip_gen: v5e
topology: v5e:2x2
jax: 0.10.0
libtpu: 0.0.40
codegen_flags: <defaults>
</compile_context>

<pallas_src>
from functools import partial

import numpy as np
import jax
import jax.numpy as jnp
from jax.experimental import pallas as pl
from jax.experimental.pallas import tpu as pltpu


LANE = 128      # TPU lane width; output last dim padded to a multiple of this
SUBLANE = 16    # min sublane tile (covers bf16 packing; also valid for f32)


def _round_up(n, m):
    return (n + m - 1) // m * m


# ----------------------------------------------------------------------------
# Pallas kernel: one (TT, 3*Cin) time tile -> x+sin(x) -> single fused MXU
# matmul -> + bias -> lane-dense (TT, Npad) store (bf16 by default).
# ----------------------------------------------------------------------------
def upsample_kernel(x_ref, w_ref, b_ref, o_ref):
    # x_ref: (TT, 3*Cin) bf16   -- [x[q-1] | x[q] | x[q+1]] lane-stacked
    # w_ref: (3*Cin, Npad) bf16 -- [Wl ; Wc ; Wr] fused effective weights
    # b_ref: (1, Npad)  f32
    # o_ref: (TT, Npad) out_dtype (bf16 default / f32)
    x = x_ref[...].astype(jnp.float32)
    xs = x + jnp.sin(x)                      # inputs + sin(inputs); sin(0)=0
                                             # keeps zero-padded edge taps zero
    y = jnp.dot(xs.astype(jnp.bfloat16), w_ref[...],
                preferred_element_type=jnp.float32)      # one MXU pass, f32 acc
    o_ref[...] = (y + b_ref[...]).astype(o_ref.dtype)


# ----------------------------------------------------------------------------
# Wrapper-side parameter prep (plain JAX glue; call ONCE, reuse per forward)
# ----------------------------------------------------------------------------
def _fused_weight_and_bias(w_ct, bias, upsample_factor, n_pad):
    """Fused effective weight slab (3*Cin, n_pad) bf16 and bias (1, n_pad) f32
    for the weight-normed ConvTranspose1d (k=2U, stride=U, pad=U//2+U%2,
    out_pad=U%2), decomposed into 3 taps (x[q-1], x[q], x[q+1]) x U phases."""
    Cin, Cout, K = w_ct.shape
    U = upsample_factor
    assert K == 2 * U
    P = U // 2 + U % 2
    r = jnp.arange(U)

    def slab(k_idx):                          # (Cin, U*Cout), column = r*Cout+o
        valid = (k_idx >= 0) & (k_idx < K)
        k_clip = jnp.clip(k_idx, 0, K - 1)
        w = w_ct[:, :, k_clip]                # (Cin, Cout, U)
        w = jnp.where(valid[None, None, :], w, 0.0)
        return jnp.transpose(w, (0, 2, 1)).reshape(Cin, U * Cout)

    w_stack = jnp.concatenate(
        [slab(r + P + U),                     # multiplies x[q-1]
         slab(r + P),                         # multiplies x[q]
         slab(r + P - U)],                    # multiplies x[q+1]
        axis=0)                               # (3*Cin, U*Cout)
    w_stack = jnp.pad(w_stack, ((0, 0), (0, n_pad - U * Cout)))

    b_eff = jnp.tile(bias[None, :], (U, 1)).reshape(1, U * Cout)
    b_eff = jnp.pad(b_eff, ((0, 0), (0, n_pad - U * Cout)))
    return w_stack.astype(jnp.bfloat16), b_eff.astype(jnp.float32)


def prepare_upsample_params(w_ct, bias, upsample_factor):
    """Precompute the fused bf16 weight slab + f32 bias (hoisted out of the
    per-forward path).  w_ct: (Cin, Cout, 2U) weight-normed ConvTranspose1d
    weight; bias: (Cout,)."""
    Cin, Cout, K = w_ct.shape
    n_out = upsample_factor * Cout
    n_pad = n_out if n_out % LANE == 0 else _round_up(n_out, LANE)
    return _fused_weight_and_bias(w_ct, bias, upsample_factor, n_pad)


# ----------------------------------------------------------------------------
# Tile sizing / VMEM budgeting (per TPU generation)
# ----------------------------------------------------------------------------
def _vmem_budget_bytes():
    """~70% of this generation's physical VMEM (v5e/v6e: 128 MiB, v7x: 64 MiB).
    Conservative 64 MiB fallback if the query is unavailable (safe on v7x)."""
    cap = 64 * 1024 * 1024
    try:
        cap = int(getattr(pltpu.get_tpu_info(), "vmem_capacity_bytes", cap))
    except Exception:
        pass
    return int(cap * 0.7)


def _choose_time_tile(T, B, n_pad, cin3, out_bytes, vmem_budget, user_tt):
    if user_tt is None:
        # Resident VMEM per grid step: double-buffered output + input tiles,
        # plus the (possibly double-buffered) weight slab and bias.
        fixed = 2 * (cin3 * n_pad * 2 + n_pad * 4)
        per_row = 2 * (n_pad * out_bytes + cin3 * 2)
        tt = max((vmem_budget - fixed) // max(per_row, 1), SUBLANE)
        tt = min(tt, 4096)
    else:
        tt = user_tt
    tt = min(int(tt), _round_up(T, SUBLANE))
    tt = max(SUBLANE, (tt // SUBLANE) * SUBLANE)
    # v7x shards parallel grid axes across 2 TensorCores: keep >= 2 grid steps.
    if B * pl.cdiv(T, tt) < 2 and T > SUBLANE:
        tt = max(SUBLANE, _round_up(pl.cdiv(T, 2), SUBLANE))
    return tt


# ----------------------------------------------------------------------------
# Forward (channel-last). Takes the prepared params from prepare_upsample_params.
# ----------------------------------------------------------------------------
@partial(jax.jit, static_argnames=("upsample_factor", "out_channels",
                                   "out_dtype", "time_tile", "keep_padded"))
def upsample_net_forward(x_btc, w_stack, b_eff, *, upsample_factor,
                         out_channels, out_dtype=jnp.bfloat16,
                         time_tile=None, keep_padded=False):
    """UpsampleNet forward (up_type='normal', no smooth/drop, no skip).

    x_btc:   (B, T, Cin) channel-last input (f32).
    w_stack: (3*Cin, n_pad) bf16, b_eff: (1, n_pad) f32 -- from
             prepare_upsample_params (call once, reuse across forwards).
    Returns (B, T*U, Cout) channel-last, or (B, T, n_pad) when keep_padded and
    U*Cout is not lane-aligned (caller fuses the unpad/reshape downstream).
    """
    B, T, Cin = x_btc.shape
    cin3 = 3 * Cin
    assert w_stack.shape[0] == cin3
    n_pad = w_stack.shape[1]
    n_out = upsample_factor * out_channels
    out_bytes = np.dtype(out_dtype).itemsize

    vmem_budget = _vmem_budget_bytes()
    TT = _choose_time_tile(T, B, n_pad, cin3, out_bytes, vmem_budget, time_tile)

    # 3-tap lane-stacking of the (small) input: [x[q-1] | x[q] | x[q+1]].
    # Zero edge frames contribute nothing (sin(0) = 0 in-kernel).
    # TODO(synk): for large-Cin / small-U configs, replace this with an
    # in-kernel halo DMA (memory_space=pl.ANY, (TT+2, Cin) window) to avoid
    # the 3x input read and the wrapper stacking pass.
    zero = jnp.zeros((B, 1, Cin), x_btc.dtype)
    x_prev = jnp.concatenate([zero, x_btc[:, :-1, :]], axis=1)
    x_next = jnp.concatenate([x_btc[:, 1:, :], zero], axis=1)
    x_stack = jnp.concatenate([x_prev, x_btc, x_next], axis=-1)
    x_stack = x_stack.astype(jnp.bfloat16)            # (B, T, 3*Cin)

    grid = (B, pl.cdiv(T, TT))                        # ragged last tile OK

    cost = pl.CostEstimate(
        flops=int(2 * B * T * cin3 * n_pad),
        transcendentals=int(B * T * cin3),
        bytes_accessed=int(B * T * cin3 * 2 + cin3 * n_pad * 2 + n_pad * 4
                           + B * T * n_pad * out_bytes),
    )

    # TODO(synk): when the (3*Cin, n_pad) weight slab is multi-MiB (production
    # U*Cout in the thousands), add an 'arbitrary' n_pad grid axis so the slab
    # is tiled instead of fully resident (v7x 64 MiB VMEM headroom).
    out_pad = pl.pallas_call(
        upsample_kernel,
        out_shape=jax.ShapeDtypeStruct((B, T, n_pad), out_dtype),
        grid=grid,
        in_specs=[
            # leading None (squeezed) batch dim -> 2-D refs inside the kernel
            pl.BlockSpec((None, TT, cin3), lambda b, t: (b, t, 0)),
            pl.BlockSpec((cin3, n_pad), lambda b, t: (0, 0)),
            pl.BlockSpec((1, n_pad), lambda b, t: (0, 0)),
        ],
        out_specs=pl.BlockSpec((None, TT, n_pad), lambda b, t: (b, t, 0)),
        compiler_params=pltpu.CompilerParams(
            # both grid axes independent -> megacore / v7x 2-TC sharding
            dimension_semantics=("parallel", "parallel"),
            vmem_limit_bytes=int(vmem_budget),
        ),
        cost_estimate=cost,
    )(x_stack, w_stack, b_eff)

    if n_pad == n_out:
        # Fast path: no lane padding -> pure (free) reshape to channel-last.
        # Element (b, t, r*Cout + o) == y_conv[b, o, t*U + r].
        return out_pad.reshape(B, T * upsample_factor, out_channels)
    if keep_padded:
        # (B, T, n_pad): let the downstream consumer fuse the unpad/reshape.
        return out_pad
    # Slow path: slicing off the lane padding costs an extra HBM pass.
    return out_pad[:, :, :n_out].reshape(B, T * upsample_factor, out_channels)


def upsample_net_forward_nct(x_nct, w_ct, bias, upsample_factor, **kw):
    """Drop-in PyTorch-layout wrapper: (B, Cin, T) -> (B, Cout, T*U).
    The transposes here are framework-boundary conversions only; keep the
    surrounding pipeline channel-last (and reuse prepare_upsample_params)
    in production."""
    w_stack, b_eff = prepare_upsample_params(w_ct, bias, upsample_factor)
    y = upsample_net_forward(jnp.transpose(x_nct, (0, 2, 1)), w_stack, b_eff,
                             upsample_factor=upsample_factor,
                             out_channels=w_ct.shape[1], **kw)
    return jnp.transpose(y, (0, 2, 1))


# ----------------------------------------------------------------------------
# Pure-numpy float64 reference (direct ConvTranspose1d definition)
# ----------------------------------------------------------------------------
def reference_forward_nct(x_nct, w_ct, bias, U):
    xs = x_nct + np.sin(x_nct)
    B, Cin, T = xs.shape
    Cout, K = w_ct.shape[1], w_ct.shape[2]
    P = U // 2 + U % 2
    out_pad = U % 2
    T_full = (T - 1) * U + K
    y = np.zeros((B, Cout, T_full), dtype=np.float64)
    for b in range(B):
        for s in range(T):
            for k in range(K):
                y[b, :, s * U + k] += w_ct[:, :, k].T @ xs[b, :, s]
    T_out = (T - 1) * U - 2 * P + K + out_pad
    return y[:, :, P:P + T_out] + bias[None, :, None]


if __name__ == "__main__":
    key = jax.random.PRNGKey(0)
    kx, kv1, kg1, kb1, kv2, kg2, kb2 = jax.random.split(key, 7)

    B, Cin, T, U = 2, 8, 80, 4     # T = 80 is deliberately NOT a multiple of 32

    x_nct = jax.random.normal(kx, (B, Cin, T), dtype=jnp.float32)   # PyTorch NCT
    x_btc = jnp.transpose(x_nct, (0, 2, 1))                          # channel-last

    def make_wn_weights(kv, kg, kb, cout):
        # weight_norm(ConvTranspose1d): weight (Cin, Cout, 2U), norm over dims
        # (1,2) per input channel (PyTorch weight_norm default dim=0).
        V = jax.random.normal(kv, (Cin, cout, 2 * U), dtype=jnp.float32) * 0.1
        g = 1.0 + 0.1 * jax.random.normal(kg, (Cin, 1, 1), dtype=jnp.float32)
        W = g * V / jnp.sqrt(jnp.sum(V * V, axis=(1, 2), keepdims=True))
        b = 0.1 * jax.random.normal(kb, (cout,), dtype=jnp.float32)
        return W, b

    # ---- Test 1: lane-aligned fast path (U*Cout = 128, no padding/unpad),
    #      bf16 output store, ragged time tiling (T=80, tile=32 -> 32/32/16) --
    Cout1 = 32
    W1, b1 = make_wn_weights(kv1, kg1, kb1, Cout1)
    w_stack1, b_eff1 = prepare_upsample_params(W1, b1, U)   # hoisted, once
    out1 = jax.block_until_ready(
        upsample_net_forward(x_btc, w_stack1, b_eff1, upsample_factor=U,
                             out_channels=Cout1, out_dtype=jnp.bfloat16,
                             time_tile=32))
    assert out1.shape == (B, T * U, Cout1), out1.shape
    ref1 = np.transpose(reference_forward_nct(np.asarray(x_nct, np.float64),
                                              np.asarray(W1, np.float64),
                                              np.asarray(b1, np.float64), U),
                        (0, 2, 1))
    np.testing.assert_allclose(np.asarray(out1, np.float64), ref1,
                               rtol=4e-2, atol=4e-2)

    # ---- Test 2: non-aligned channels (U*Cout = 64 -> padded to 128),
    #      f32 output, auto VMEM-derived time tile, PyTorch NCT wrapper ------
    Cout2 = 16
    W2, b2 = make_wn_weights(kv2, kg2, kb2, Cout2)
    out2 = jax.block_until_ready(
        upsample_net_forward_nct(x_nct, W2, b2, U, out_dtype=jnp.float32))
    assert out2.shape == (B, Cout2, T * U), out2.shape
    ref2 = reference_forward_nct(np.asarray(x_nct, np.float64),
                                 np.asarray(W2, np.float64),
                                 np.asarray(b2, np.float64), U)
    np.testing.assert_allclose(np.asarray(out2, np.float64), ref2,
                               rtol=3e-2, atol=3e-2)

    print("KERNEL_OK")
</pallas_src>

<mosaic_0001>
module attributes {stable_mosaic.version = 11 : i64} {
  func.func @upsample_kernel(%arg0: i32, %arg1: i32, %arg2: memref<1x32x24xbf16, #tpu.memory_space<vmem>>, %arg3: memref<24x128xbf16, #tpu.memory_space<vmem>>, %arg4: memref<1x128xf32, #tpu.memory_space<vmem>>, %arg5: memref<1x32x128xbf16, #tpu.memory_space<vmem>>) attributes {dimension_semantics = [#tpu.dimension_semantics<parallel>, #tpu.dimension_semantics<parallel>], iteration_bounds = array<i64: 2, 3>, scalar_prefetch = 0 : i64, scratch_operands = 0 : i64, tpu.core_type = #tpu.core_type<tc>, window_params = [{transform_indices = @transform_0, window_bounds = array<i64: 1, 32, 24>}, {pipeline_mode = #tpu.pipeline_mode<synchronous>, transform_indices = @transform_1, window_bounds = array<i64: 24, 128>}, {pipeline_mode = #tpu.pipeline_mode<synchronous>, transform_indices = @transform_2, window_bounds = array<i64: 1, 128>}, {transform_indices = @transform_3, window_bounds = array<i64: 1, 32, 128>}]} {
    %c0 = arith.constant 0 : index
    %c0_0 = arith.constant 0 : index
    %c0_1 = arith.constant 0 : index
    %0 = vector.load %arg2[%c0, %c0_0, %c0_1] : memref<1x32x24xbf16, #tpu.memory_space<vmem>>, vector<1x32x24xbf16>
    %1 = vector.shape_cast %0 : vector<1x32x24xbf16> to vector<32x24xbf16>
    %2 = arith.extf %1 : vector<32x24xbf16> to vector<32x24xf32>
    %3 = math.sin %2 : vector<32x24xf32>
    %4 = arith.addf %2, %3 : vector<32x24xf32>
    %5 = arith.truncf %4 : vector<32x24xf32> to vector<32x24xbf16>
    %c0_2 = arith.constant 0 : index
    %c0_3 = arith.constant 0 : index
    %6 = vector.load %arg3[%c0_2, %c0_3] : memref<24x128xbf16, #tpu.memory_space<vmem>>, vector<24x128xbf16>
    %cst = arith.constant dense<0.000000e+00> : vector<32x128xf32>
    %7 = tpu.matmul %5, %6, %cst {dimension_numbers = #tpu.dot_dimension_numbers<[1], [0], [0], [1], [0, 0, 1, 1], [], []>} : vector<32x24xbf16>, vector<24x128xbf16>, vector<32x128xf32> -> vector<32x128xf32>
    %c0_4 = arith.constant 0 : index
    %c0_5 = arith.constant 0 : index
    %8 = vector.load %arg4[%c0_4, %c0_5] : memref<1x128xf32, #tpu.memory_space<vmem>>, vector<1x128xf32>
    %9 = vector.broadcast %8 : vector<1x128xf32> to vector<32x128xf32>
    %10 = arith.addf %7, %9 : vector<32x128xf32>
    %11 = arith.truncf %10 : vector<32x128xf32> to vector<32x128xbf16>
    %c0_6 = arith.constant 0 : index
    %c0_7 = arith.constant 0 : index
    %c0_8 = arith.constant 0 : index
    %12 = vector.load %arg5[%c0_6, %c0_7, %c0_8] : memref<1x32x128xbf16, #tpu.memory_space<vmem>>, vector<1x32x128xbf16>
    %13 = vector.shape_cast %12 : vector<1x32x128xbf16> to vector<32x128xbf16>
    %14 = vector.shape_cast %11 : vector<32x128xbf16> to vector<1x32x128xbf16>
    tpu.vector_store %arg5[%c0_6, %c0_7, %c0_8], %14 {strides = array<i32>} : memref<1x32x128xbf16, #tpu.memory_space<vmem>>, vector<1x32x128xbf16>,
    return
  }
  func.func @transform_0(%arg0: i32, %arg1: i32) -> (i32, i32, i32) {
    %c0_i32 = arith.constant 0 : i32
    %c0_i32_0 = arith.constant 0 : i32
    return %arg0, %arg1, %c0_i32 : i32, i32, i32
  }
  func.func @transform_1(%arg0: i32, %arg1: i32) -> (i32, i32) {
    %c0_i32 = arith.constant 0 : i32
    %c0_i32_0 = arith.constant 0 : i32
    %c0_i32_1 = arith.constant 0 : i32
    return %c0_i32, %c0_i32_0 : i32, i32
  }
  func.func @transform_2(%arg0: i32, %arg1: i32) -> (i32, i32) {
    %c0_i32 = arith.constant 0 : i32
    %c0_i32_0 = arith.constant 0 : i32
    %c0_i32_1 = arith.constant 0 : i32
    return %c0_i32, %c0_i32_0 : i32, i32
  }
  func.func @transform_3(%arg0: i32, %arg1: i32) -> (i32, i32, i32) {
    %c0_i32 = arith.constant 0 : i32
    %c0_i32_0 = arith.constant 0 : i32
    return %arg0, %arg1, %c0_i32 : i32, i32, i32
  }
}

</mosaic_0001>

<bundles_post_ra>
// kernel: upsample_net_forward.1
= control target key start
LH: loop header
LB: loop body
LE: loop exit
PB: predicated region body
PF: predicated region fallthrough
CT: control target
= control target key end

     0   :  { %s1504_s12 = smov 0   ;;  %s1506_s13 = smov 0   ;;  %s2124_s0 = inlined_call_operand.vmem [shape: bf16[2,80,24], index: 0, kind: input, shape index: {}]   ;;  %s2125_s1 = inlined_call_operand.vmem [shape: bf16[24,128], index: 1, kind: input, shape index: {}]   ;;  %s2126_s2 = inlined_call_operand.vmem [shape: f32[1,128], index: 2, kind: input, shape index: {}]   ;;  %s2127_s3 = inlined_call_operand.vmem [shape: bf16[2,80,128], index: 3, kind: output, shape index: {}]  }
   0x1   :  { %s1508_s14 = smov 0   ;;  %s1510_s15 = smov 0  }
   0x2   :  { %s1512_s16 = smov 0   ;;  %s1514_s17 = smov 0  }
   0x3   :  { %s1516_s18 = smov 0  }
   0x4 LB: > { %s22_s19 = sadd.s32 1, %s1435_s16  ;;  %s25_s20 = sadd.s32 1, %s1439_s17  ;;  %s1443_s18 = sphi %s1516_s18, %s13_s18   ;;  %s1439_s17 = sphi %s1514_s17, %s2145_s17   ;;  %s1435_s16 = sphi %s1512_s16, %s2144_s16   ;;  %s1431_s15 = sphi %s1510_s15, %s2143_s15   ;;  %s1427_s14 = sphi %s1508_s14, %s2142_s14   ;;  %s1423_s13 = sphi %s1506_s13, %s2141_s13   ;;  %s1419_s12 = sphi %s1504_s12, %s2140_s12  }
   0x5   : > { %p23_p0 = scmp.ge.s32.totalorder %s22_s19, 3  ;;  %s1159_s21 = sadd.s32 4294967295, %s1443_s18  }
   0x6   : > { %p114_p1 = scmp.ne.s32.totalorder %s1423_s13, %s1419_s12  ;;  %p115_p2 = scmp.eq.s32.totalorder %s1159_s21, 5 }
   0x7   : > { %s2147_s19 = smov (%p23_p0, %s22_s19), 0  ;;  %s2149_s20 = smov (!%p23_p0, %s25_s20), %s1439_s17 }
   0x8   : > { %s100_s22 = ssub.s32 %s1435_s16, %s2147_s19  ;;  %p27_p3 = scmp.ge.s32.totalorder %s2149_s20, 2 }
   0x9   : > { %p1163_p4 = scmp.ge.s32.totalorder %s1443_s18, 1  ;;  %p1548_p5 = por %p115_p2, %p114_p1 }
   0xa   : > { %p166_p6 = scmp.lt.s32.totalorder %s1443_s18, 7  ;;  %s2151_s20 = smov (%p27_p3, %s2149_s20), 0 }
   0xb   : > { %s99_s24 = ssub.s32 %s1439_s17, %s2151_s20  ;;  %s104_s26 = sadd.s32 1, %s1423_s13 }
   0xc   : > { %p167_p7 = pnand %p1163_p4, %p166_p6  ;;  %s101_s25 = sor.u32 %s100_s22, %s99_s24 }
   0xd   : > { %p102_p8 = scmp.eq.s32.totalorder %s101_s25, 0  ;;  %s1561_s28 = sshll.u32 (!%p167_p7), %s1427_s14, 2 }
   0xe   : > { %170 = sbr.rel (%p167_p7) target bundleno = 393 (0x189), region = 32  ;;  %p202_p9 = scmp.lt.s32.totalorder (!%p167_p7), %s1431_s15, 1 }
   0xf   : > { %s1559_s27 = scalar_select %p102_p8, %s1423_s13, %s104_s26  }
  0x10   : > { %p204_p10 = scmp.lt.s32.totalorder (!%p167_p7), %s1561_s28, 9  ;;  %s194_s22 = sand.u32 (!%p167_p7), 1, %s1419_s12  }
  0x11   : > { %s1164_s26 = sshll.u32 (!%p167_p7), %s194_s22, 4 }
  0x13   : > { %s203_s29 = scalar_select %p202_p9, %s1431_s15, 1  ;;  %v1477_v30 = vmov 683565275   ;;  %v1478_v32 = vmov 2475754826  }
  0x14   : > { %s205_s30 = scalar_select %p204_p10, %s1561_s28, 9  ;;  %v1479_v34 = vmov 2131351028   ;;  %v1480_v36 = vmov 2102212464  }
  0x15   : > { %s1227_s4 = smul.u32 10, %s203_s29  ;;  %v1481_v38 = vmov 920167782   ;;  %v1482_v47 = vmov 1326507024   ;;  %s2052_s29 = scalar_lea.vmem [#allocation2], %s1164_s26  }
  0x16   : > { %s917_s12 = ssub.s32 (%p1548_p5), 10, %s1561_s28 }
  0x17   : > { %s207_s5 = sadd.s32 %s1227_s4, %s205_s30  ;;  %s1228_s30 = smul.u32 (%p1548_p5), 10, %s1431_s15 }
  0x18   : > { %s1166_s6 = sshll.u32 %s207_s5, 2  ;;  %p918_p11 = scmp.lt.s32.totalorder (%p1548_p5), %s917_s12, 4 }
  0x19   : > { %s209_s9 = scalar_lea.vmem %s2124_s0, %s1166_s6  ;;  %s923_s4 = sadd.s32 (%p1548_p5), %s1228_s30, %s1561_s28 }
  0x1a   : > { %v1206_v0 = vld [vmem:[%s209_s9] sm:$0xff]   ;;  %v1570_v1 = vld [vmem:[%s209_s9 + $0x8] sm:$0xff]   ;;  %s1189_s5 = sshll.u32 (%p1548_p5), %s923_s4, 2 }
  0x1b   : > { %v1572_v2 = vunpack.c.l.bf16 %v1206_v0  ;;  %v1574_v3 = vunpack.c.h.bf16 %v1206_v0  ;;  %v1577_v4 = vunpack.c.l.bf16 %v1570_v1  ;;  %s2067_s9 = scalar_lea.vmem (%p1548_p5), %s2127_s3, %s1189_s5  }
  0x1d   : > { %v229_v5 = vand.u32 2147483647, %v1572_v2  ;;  %v232_v6 = vand.u32 2139095040, %v1572_v2  ;;  %v384_v7 = vand.u32 2147483647, %v1574_v3  ;;  %v387_v8 = vand.u32 2139095040, %v1574_v3 }
  0x1e   : > { %v542_v9 = vand.u32 2139095040, %v1577_v4 }
  0x1f   : > { %v233_v10 = vshrl.u32 %v232_v6, 23  ;;  %v236_v11 = vand.u32 8388607, %v229_v5  ;;  %v388_v12 = vshrl.u32 %v387_v8, 23  ;;  %v391_v13 = vand.u32 8388607, %v384_v7 }
  0x20   : > { %v543_v17 = vshrl.u32 %v542_v9, 23 }
  0x21   : > { %v1167_v14 = vadd.s32 4294967169, %v233_v10  ;;  %v237_v15 = vor.u32 8388608, %v236_v11  ;;  %v1170_v16 = vadd.s32 4294967169, %v388_v12  ;;  %v392_v19 = vor.u32 8388608, %v391_v13 }
  0x22   : > { %v1173_v23 = vadd.s32 4294967169, %v543_v17 }
  0x23   : > { %v239_v18 = vadd.s32 1, %v1167_v14  ;;  %v394_v20 = vadd.s32 1, %v1170_v16  ;;  %v1588_v22 = vshll.u32 %v237_v15, 8  ;;  %v1594_v28 = vshll.u32 %v392_v19, 8 }
  0x24   : > { %v1602_v41 = vadd.s32 1, %v1173_v23 }
  0x25   : > { %vm240_vm0 = vcmp.gt.s32.totalorder %v239_v18, 0  ;;  %vm395_vm1 = vcmp.gt.s32.totalorder %v394_v20, 0  ;;  %v278_v40 = vand.u32 65535, %v1588_v22  ;;  %v279_v45 = vshrl.u32 %v1588_v22, 16 }
  0x26   : > { %v241_v21 = vsel %vm240_vm0, %v239_v18, 0  ;;  %v396_v25 = vsel %vm395_vm1, %v394_v20, 0  ;;  %vm550_vm15 = vcmp.gt.s32.totalorder %v1602_v41, 0 }
  0x27   : > { %v243_v24 = vand.u32 31, %v241_v21  ;;  %v1590_v26 = vshrl.u32 %v241_v21, 5  ;;  %v1592_v27 = vand.u32 31, %v396_v25  ;;  %v1622_v58 = vshrl.u32 %v396_v25, 5 }
  0x29   : > { %v244_v29 = vsub.s32 32, %v243_v24  ;;  %v246_v31 = vshll.u32 %v1477_v30, %v243_v24  ;;  %v249_v33 = vshll.u32 %v1478_v32, %v243_v24  ;;  %v252_v35 = vshll.u32 %v1479_v34, %v243_v24 }
  0x2a   : > { %v255_v37 = vshll.u32 %v1480_v36, %v243_v24  ;;  %v258_v39 = vshll.u32 %v1481_v38, %v243_v24  ;;  %vm261_vm2 = vcmp.lt.s32.totalorder %v1590_v26, 1  ;;  %vm264_vm3 = vcmp.lt.s32.totalorder %v1590_v26, 4 }
  0x2b   : > { %v247_v42 = vshrl.u32 %v1478_v32, %v244_v29  ;;  %v250_v43 = vshrl.u32 %v1479_v34, %v244_v29  ;;  %v253_v44 = vshrl.u32 %v1480_v36, %v244_v29  ;;  %v256_v46 = vshrl.u32 %v1481_v38, %v244_v29 }
  0x2c   : > { %v259_v48 = vshrl.u32 %v1482_v47, %v244_v29  ;;  %v1613_v52 = vsub.s32 32, %v1592_v27  ;;  %v245_v53 = vshrl.u32 %v1477_v30, %v244_v29  ;;  %vm263_vm4 = vcmp.lt.s32.totalorder %v1590_v26, 3 }
  0x2d   : > { %v248_v49 = vor.u32 %v247_v42, %v246_v31  ;;  %v251_v50 = vor.u32 %v250_v43, %v249_v33  ;;  %v254_v51 = vor.u32 %v253_v44, %v252_v35  ;;  %v257_v54 = vor.u32 %v256_v46, %v255_v37 }
  0x2e   : > { %v260_v55 = vor.u32 %v259_v48, %v258_v39  ;;  %vm262_vm5 = vcmp.lt.s32.totalorder %v1590_v26, 2  ;;  %v401_v61 = vshll.u32 %v1477_v30, %v1592_v27  ;;  %v404_v62 = vshll.u32 %v1478_v32, %v1592_v27 }
  0x2f   : > { %v269_v56 = vsel %vm261_vm2, %v248_v49, %v251_v50  ;;  %v273_v57 = vsel %vm261_vm2, %v251_v50, %v254_v51  ;;  %v270_v59 = vsel %vm264_vm3, %v257_v54, 920167782  ;;  %v266_v63 = vsel %vm264_vm3, %v254_v51, 2102212464 }
  0x30   : > { %v274_v60 = vsel %vm264_vm3, %v260_v55, 1326507024  ;;  %v271_v0 = vsel %vm263_vm4, %v254_v51, %v270_v59  ;;  %v402_v8 = vshrl.u32 %v1478_v32, %v1613_v52  ;;  %v265_v9 = vsel %vm261_vm2, %v245_v53, %v248_v49 }
  0x31   : > { %v275_v6 = vsel %vm263_vm4, %v257_v54, %v274_v60  ;;  %v272_v10 = vsel %vm262_vm5, %v269_v56, %v271_v0  ;;  %v405_v12 = vshrl.u32 %v1479_v34, %v1613_v52  ;;  %v267_v17 = vsel %vm263_vm4, %v251_v50, %v266_v63 }
  0x32   : > { %v276_v11 = vsel %vm262_vm5, %v273_v57, %v275_v6  ;;  %v302_v15 = vand.u32 65535, %v272_v10  ;;  %v303_v16 = vshrl.u32 %v272_v10, 16  ;;  %v1650_v18 = vor.u32 %v402_v8, %v401_v61 }
  0x33   : > { %v280_v13 = vand.u32 65535, %v276_v11  ;;  %v281_v14 = vshrl.u32 %v276_v11, 16  ;;  %v1652_v19 = vor.u32 %v405_v12, %v404_v62  ;;  %v407_v20 = vshll.u32 %v1479_v34, %v1592_v27 }
  0x34   : > { %v408_v25 = vshrl.u32 %v1480_v36, %v1613_v52  ;;  %v304_v31 = vmul.u32 %v302_v15, %v278_v40  ;;  %v305_v33 = vmul.u32 %v303_v16, %v278_v40  ;;  %v306_v35 = vmul.u32 %v302_v15, %v279_v45 }
  0x35   : > { %v282_v21 = vmul.u32 %v280_v13, %v278_v40  ;;  %v283_v23 = vmul.u32 %v281_v14, %v278_v40  ;;  %v284_v24 = vmul.u32 %v280_v13, %v279_v45  ;;  %v285_v29 = vmul.u32 %v281_v14, %v279_v45 }
  0x36   : > { %v307_v43 = vmul.u32 %v303_v16, %v279_v45  ;;  %v308_v46 = vshll.u32 %v305_v33, 16  ;;  %v309_v48 = vshrl.u32 %v305_v33, 16  ;;  %v310_v49 = vshll.u32 %v306_v35, 16 }
  0x37   : > { %v286_v37 = vshll.u32 %v283_v23, 16  ;;  %v287_v39 = vshrl.u32 %v283_v23, 16  ;;  %v288_v42 = vshll.u32 %v284_v24, 16  ;;  %v289_v44 = vshrl.u32 %v284_v24, 16 }
  0x38   : > { %v311_v51 = vshrl.u32 %v306_v35, 16  ;;  %v410_v53 = vshll.u32 %v1480_v36, %v1592_v27  ;;  %v1483_v54 = vmov 0   ;;  %vm312_vm7 = vc.u32 %v304_v31, %v308_v46 }
  0x39   : > { %vm290_vm6 = vc.u32 %v282_v21, %v286_v37  ;;  %v292_v50 = vadd.s32 %v286_v37, %v282_v21  ;;  %v314_v40 = vadd.s32 %v308_v46, %v304_v31  ;;  %v411_v56 = vshrl.u32 %v1481_v38, %v1613_v52 }
  0x3a   : > { %v291_v55 = vsel %vm290_vm6, 1, %v1483_v54  ;;  %v313_v45 = vsel %vm312_vm7, 1, %v1483_v54  ;;  %v413_v59 = vshll.u32 %v1481_v38, %v1592_v27  ;;  %v409_v62 = vor.u32 %v408_v25, %v407_v20 }
  0x3b   : > { %v293_v57 = vadd.s32 %v291_v55, %v285_v29  ;;  %vm294_vm8 = vc.u32 %v292_v50, %v288_v42  ;;  %v315_v61 = vadd.s32 %v313_v45, %v307_v43  ;;  %vm316_vm9 = vc.u32 %v314_v40, %v310_v49 }
  0x3c   : > { %v295_v60 = vsel %vm294_vm8, 1, %v1483_v54  ;;  %v317_v0 = vsel %vm316_vm9, 1, %v1483_v54  ;;  %v412_v6 = vor.u32 %v411_v56, %v410_v53  ;;  %v414_v8 = vshrl.u32 %v1482_v47, %v1613_v52 }
  0x3d   : > { %v297_v63 = vadd.s32 %v295_v60, %v293_v57  ;;  %v1670_v10 = vadd.s32 %v314_v40, %v310_v49  ;;  %v319_v11 = vadd.s32 %v317_v0, %v315_v61  ;;  %vm416_vm10 = vcmp.lt.s32.totalorder %v1622_v58, 1 }
  0x3e   : > { %vm418_vm11 = vcmp.lt.s32.totalorder %v1622_v58, 3  ;;  %v415_v12 = vor.u32 %v414_v8, %v413_v59  ;;  %vm417_vm12 = vcmp.lt.s32.totalorder %v1622_v58, 2  ;;  %vm419_vm13 = vcmp.lt.s32.totalorder %v1622_v58, 4 }
  0x3f   : > { %v298_v27 = vadd.s32 %v297_v63, %v287_v39  ;;  %v268_v13 = vsel %vm262_vm5, %v265_v9, %v267_v17  ;;  %v320_v14 = vadd.s32 %v319_v11, %v309_v48  ;;  %v424_v15 = vsel %vm416_vm10, %v1650_v18, %v1652_v19 }
  0x40   : > { %v425_v16 = vsel %vm419_vm13, %v412_v6, 920167782  ;;  %v428_v23 = vsel %vm416_vm10, %v1652_v19, %v409_v62  ;;  %v433_v26 = vand.u32 65535, %v1594_v28  ;;  %v429_v24 = vsel %vm419_vm13, %v415_v12, 1326507024 }
  0x41   : > { %v1684_v20 = vadd.s32 %v298_v27, %v289_v44  ;;  %v426_v21 = vsel %vm418_vm11, %v409_v62, %v425_v16  ;;  %v321_v9 = vadd.s32 %v320_v14, %v311_v51  ;;  %v434_v25 = vshrl.u32 %v1594_v28, 16 }
  0x42   : > { %v427_v17 = vsel %vm417_vm12, %v424_v15, %v426_v21  ;;  %v322_v29 = vmul.u32 %v1588_v22, %v268_v13  ;;  %v430_v31 = vsel %vm418_vm11, %v412_v6, %v429_v24  ;;  %v400_v42 = vshrl.u32 %v1477_v30, %v1613_v52 }
  0x43   : > { %vm324_vm14 = vc.u32 %v1684_v20, %v1670_v10  ;;  %v457_v33 = vand.u32 65535, %v427_v17  ;;  %v325_v35 = vadd.s32 1, %v321_v9  ;;  %v431_v37 = vsel %vm417_vm12, %v428_v23, %v430_v31 }
  0x44   : > { %v458_v39 = vshrl.u32 %v427_v17, 16  ;;  %v435_v43 = vand.u32 65535, %v431_v37  ;;  %v436_v44 = vshrl.u32 %v431_v37, 16  ;;  %v421_v46 = vsel %vm419_vm13, %v409_v62, 2102212464 }
  0x45   : > { %v326_v22 = vsel %vm324_vm14, %v325_v35, %v321_v9  ;;  %v461_v49 = vmul.u32 %v457_v33, %v434_v25  ;;  %v459_v55 = vmul.u32 %v457_v33, %v433_v26  ;;  %v551_v57 = vsel %vm550_vm15, %v1602_v41, 0 }
  0x46   : > { %v460_v48 = vmul.u32 %v458_v39, %v433_v26  ;;  %v327_v50 = vadd.s32 %v326_v22, %v322_v29  ;;  %v437_v51 = vmul.u32 %v435_v43, %v433_v26  ;;  %v438_v53 = vmul.u32 %v436_v44, %v433_v26 }
  0x47   : > { %v439_v40 = vmul.u32 %v435_v43, %v434_v25  ;;  %v420_v52 = vsel %vm416_vm10, %v400_v42, %v1650_v18  ;;  %v440_v59 = vmul.u32 %v436_v44, %v434_v25  ;;  %v422_v61 = vsel %vm418_vm11, %v1652_v19, %v421_v46 }
  0x48   : > { %v463_v56 = vshll.u32 %v460_v48, 16  ;;  %v328_v45 = vadd.s32 536870912, %v327_v50  ;;  %v441_v60 = vshll.u32 %v438_v53, 16  ;;  %v462_v63 = vmul.u32 %v458_v39, %v434_v25 }
  0x49   : > { %v443_v62 = vshll.u32 %v439_v40, 16  ;;  %v465_v0 = vshll.u32 %v461_v49, 16  ;;  %v442_v41 = vshrl.u32 %v438_v53, 16  ;;  %v464_v14 = vshrl.u32 %v460_v48, 16 }
  0x4a   : > { %v1716_v6 = vshrl.u32 %v328_v45, 30  ;;  %vm445_vm0 = vc.u32 %v437_v51, %v441_v60  ;;  %v447_v8 = vadd.s32 %v441_v60, %v437_v51  ;;  %vm467_vm1 = vc.u32 %v459_v55, %v463_v56 }
  0x4b   : > { %v446_v11 = vsel %vm445_vm0, 1, %v1483_v54  ;;  %v468_v27 = vsel %vm467_vm1, 1, %v1483_v54  ;;  %v469_v18 = vadd.s32 %v463_v56, %v459_v55  ;;  %v444_v19 = vshrl.u32 %v439_v40, 16 }
  0x4c   : > { %v330_v12 = vshll.u32 %v1716_v6, 30  ;;  %v448_v13 = vadd.s32 %v446_v11, %v440_v59  ;;  %vm449_vm2 = vc.u32 %v447_v8, %v443_v62  ;;  %v470_v16 = vadd.s32 %v468_v27, %v462_v63 }
  0x4d   : > { %v450_v15 = vsel %vm449_vm2, 1, %v1483_v54  ;;  %vm471_vm3 = vc.u32 %v469_v18, %v465_v0  ;;  %v553_v9 = vand.u32 31, %v551_v57  ;;  %v466_v17 = vshrl.u32 %v461_v49, 16 }
  0x4e   : > { %v1722_v21 = vsub.s32 %v327_v50, %v330_v12  ;;  %v452_v23 = vadd.s32 %v450_v15, %v448_v13  ;;  %v472_v26 = vsel %vm471_vm3, 1, %v1483_v54  ;;  %v1727_v31 = vadd.s32 %v469_v18, %v465_v0 }
  0x4f   : > { %v474_v24 = vadd.s32 %v472_v26, %v470_v16  ;;  %v423_v33 = vsel %vm417_vm12, %v420_v52, %v422_v61  ;;  %v1734_v42 = vsub.s32 32, %v553_v9  ;;  %v539_v48 = vand.u32 2147483647, %v1577_v4 }
  0x50   : > { %vm332_vm4 = vcmp.lt.s32.totalorder %v1722_v21, 0  ;;  %v333_v25 = vsub.s32 0, %v1722_v21  ;;  %v453_v29 = vadd.s32 %v452_v23, %v442_v41  ;;  %v477_v22 = vmul.u32 %v1594_v28, %v423_v33 }
  0x51   : > { %v475_v35 = vadd.s32 %v474_v24, %v464_v14  ;;  %v1740_v49 = vshrl.u32 %v551_v57, 5  ;;  %v559_v58 = vshll.u32 %v1478_v32, %v553_v9  ;;  %v560_v50 = vshrl.u32 %v1479_v34, %v1734_v42 }
  0x52   : > { %v334_v37 = vsel %vm332_vm4, %v333_v25, %v1722_v21  ;;  %v1732_v39 = vadd.s32 %v453_v29, %v444_v19  ;;  %v562_v51 = vshll.u32 %v1479_v34, %v553_v9  ;;  %v565_v40 = vshll.u32 %v1480_v36, %v553_v9 }
  0x53   : > { %v335_v43 = vclz %v334_v37  ;;  %v476_v44 = vadd.s32 %v475_v35, %v466_v17  ;;  %v566_v28 = vshrl.u32 %v1481_v38, %v1734_v42  ;;  %v563_v45 = vshrl.u32 %v1480_v36, %v1734_v42 }
  0x54   : > { %vm479_vm5 = vc.u32 %v1732_v39, %v1727_v31  ;;  %v568_v57 = vshll.u32 %v1481_v38, %v553_v9  ;;  %v569_v52 = vshrl.u32 %v1482_v47, %v1734_v42  ;;  %v546_v59 = vand.u32 8388607, %v539_v48 }
  0x55   : > { %v480_v46 = vadd.s32 1, %v476_v44  ;;  %v1168_v53 = vadd.s32 4294967294, %v335_v43  ;;  %v556_v60 = vshll.u32 %v1477_v30, %v553_v9  ;;  %v557_v61 = vshrl.u32 %v1478_v32, %v1734_v42 }
  0x56   : > { %v1759_v63 = vor.u32 %v560_v50, %v559_v58  ;;  %v567_v0 = vor.u32 %v566_v28, %v565_v40  ;;  %v564_v41 = vor.u32 %v563_v45, %v562_v51  ;;  %v570_v11 = vor.u32 %v569_v52, %v568_v57 }
  0x57   : > { %v481_v55 = vsel %vm479_vm5, %v480_v46, %v476_v44  ;;  %vm1169_vm6 = vcmp.lt.s32.totalorder %v1168_v53, 0  ;;  %vm574_vm7 = vcmp.lt.s32.totalorder %v1740_v49, 4  ;;  %v547_v27 = vor.u32 8388608, %v546_v59 }
  0x58   : > { %v482_v56 = vadd.s32 %v481_v55, %v477_v22  ;;  %v1764_v18 = vor.u32 %v557_v61, %v556_v60  ;;  %vm571_vm8 = vcmp.lt.s32.totalorder %v1740_v49, 1  ;;  %v338_v12 = vsel %vm1169_vm6, 0, %v1168_v53 }
  0x59   : > { %vm573_vm9 = vcmp.lt.s32.totalorder %v1740_v49, 3  ;;  %vm572_vm10 = vcmp.lt.s32.totalorder %v1740_v49, 2  ;;  %v580_v14 = vsel %vm574_vm7, %v567_v0, 920167782  ;;  %v583_v15 = vsel %vm571_vm8, %v1759_v63, %v564_v41 }
  0x5a   : > { %v483_v62 = vadd.s32 536870912, %v482_v56  ;;  %v584_v16 = vsel %vm574_vm7, %v570_v11, 1326507024  ;;  %v343_v23 = vsub.s32 4294967266, %v338_v12  ;;  %v579_v26 = vsel %vm571_vm8, %v1764_v18, %v1759_v63 }
  0x5b   : > { %v585_v9 = vsel %vm573_vm9, %v567_v0, %v584_v16  ;;  %v1785_v17 = vshll.u32 %v547_v27, 8  ;;  %v581_v25 = vsel %vm573_vm9, %v564_v41, %v580_v14  ;;  %v323_v43 = vadd.s32 %v1670_v10, %v1684_v20 }
  0x5c   : > { %v1761_v8 = vshrl.u32 %v483_v62, 30  ;;  %v586_v29 = vsel %vm572_vm10, %v583_v15, %v585_v9  ;;  %v339_v46 = vsub.s32 32, %v338_v12  ;;  %v582_v50 = vsel %vm572_vm10, %v579_v26, %v581_v25 }
  0x5d   : > { %v588_v33 = vand.u32 65535, %v1785_v17  ;;  %v589_v35 = vshrl.u32 %v1785_v17, 16  ;;  %v590_v37 = vand.u32 65535, %v586_v29  ;;  %v591_v22 = vshrl.u32 %v586_v29, 16 }
  0x5e   : > { %v485_v13 = vshll.u32 %v1761_v8, 30  ;;  %v344_v53 = vadd.s32 127, %v343_v23  ;;  %v613_v52 = vshrl.u32 %v582_v50, 16  ;;  %v341_v59 = vshrl.u32 %v323_v43, %v339_v46 }
  0x5f   : > { %v594_v51 = vmul.u32 %v590_v37, %v589_v35  ;;  %v592_v55 = vmul.u32 %v590_v37, %v588_v33  ;;  %v593_v40 = vmul.u32 %v591_v22, %v588_v33  ;;  %v595_v10 = vmul.u32 %v591_v22, %v589_v35 }
  0x60   : > { %v1772_v19 = vsub.s32 %v482_v56, %v485_v13  ;;  %v340_v56 = vshll.u32 %v1722_v21, %v338_v12  ;;  %v612_v20 = vand.u32 65535, %v582_v50  ;;  %v345_v60 = vshll.u32 %v344_v53, 23 }
  0x61   : > { %v596_v45 = vshll.u32 %v593_v40, 16  ;;  %v598_v57 = vshll.u32 %v594_v51, 16  ;;  %v615_v27 = vmul.u32 %v613_v52, %v588_v33  ;;  %v555_v13 = vshrl.u32 %v1477_v30, %v1734_v42 }
  0x62   : > { %vm487_vm11 = vcmp.lt.s32.totalorder %v1772_v19, 0  ;;  %v488_v24 = vsub.s32 0, %v1772_v19  ;;  %v616_v12 = vmul.u32 %v612_v20, %v589_v35  ;;  %v342_v14 = vor.u32 %v341_v59, %v340_v56 }
  0x63   : > { %vm600_vm13 = vc.u32 %v592_v55, %v596_v45  ;;  %v602_v62 = vadd.s32 %v596_v45, %v592_v55  ;;  %v346_v15 = vor.u32 4788187, %v345_v60  ;;  %v478_v16 = vadd.s32 %v1727_v31, %v1732_v39 }
  0x64   : > { %v489_v44 = vsel %vm487_vm11, %v488_v24, %v1772_v19  ;;  %v601_v11 = vsel %vm600_vm13, 1, %v1483_v54  ;;  %v614_v23 = vmul.u32 %v612_v20, %v588_v33  ;;  %v576_v9 = vsel %vm574_vm7, %v564_v41, 2102212464 }
  0x65   : > { %v490_v58 = vclz %v489_v44  ;;  %vm604_vm14 = vc.u32 %v602_v62, %v598_v57  ;;  %v603_v21 = vadd.s32 %v601_v11, %v595_v10  ;;  %v597_v24 = vshrl.u32 %v593_v40, 16 }
  0x66   : > { %v605_v25 = vsel %vm604_vm14, 1, %v1483_v54  ;;  %v617_v43 = vmul.u32 %v613_v52, %v589_v35  ;;  %v618_v44 = vshll.u32 %v615_v27, 16  ;;  %v1810_v42 = vunpack.c.h.bf16 %v1570_v1 }
  0x67   : > { %v1171_v28 = vadd.s32 4294967294, %v490_v58  ;;  %v607_v37 = vadd.s32 %v605_v25, %v603_v21  ;;  %v575_v22 = vsel %vm571_vm8, %v555_v13, %v1764_v18  ;;  %v620_v31 = vshll.u32 %v616_v12, 16 }
  0x68   : > { %v347_v39 = vand.u32 2147483647, %v346_v15  ;;  %v349_v33 = vcvt.s32.f32 %v342_v14  ;;  %v577_v41 = vsel %vm573_vm9, %v1759_v63, %v576_v9  ;;  %vm622_vm15 = vc.u32 %v614_v23, %v618_v44 }
  0x69   : > { %vm1172_vm12 = vcmp.lt.s32.totalorder %v1171_v28, 0  ;;  %v623_v35 = vsel %vm622_vm15, 1, %v1483_v54  ;;  %v624_v50 = vadd.s32 %v618_v44, %v614_v23  ;;  %v599_v53 = vshrl.u32 %v594_v51, 16 }
  0x6a   : > { %v493_v61 = vsel %vm1172_vm12, 0, %v1171_v28  ;;  %v608_v55 = vadd.s32 %v607_v37, %v597_v24  ;;  %v625_v40 = vadd.s32 %v623_v35, %v617_v43  ;;  %v619_v28 = vshrl.u32 %v615_v27, 16 }
  0x6b   : > { %v498_v0 = vsub.s32 4294967266, %v493_v61  ;;  %v494_v26 = vsub.s32 32, %v493_v61  ;;  %v495_v46 = vshll.u32 %v1772_v19, %v493_v61  ;;  %vm626_vm0 = vc.u32 %v624_v50, %v620_v31 }
  0x6c   : > { %v578_v18 = vsel %vm572_vm10, %v575_v22, %v577_v41  ;;  %v627_v56 = vsel %vm626_vm0, 1, %v1483_v54  ;;  %v697_v63 = vand.u32 2139095040, %v1810_v42  ;;  %v350_v45 = vmul.f32 %v349_v33, %v347_v39 }
  0x6d   : > { %v499_v29 = vadd.s32 127, %v498_v0  ;;  %v496_v58 = vshrl.u32 %v478_v16, %v494_v26  ;;  %v621_v19 = vshrl.u32 %v616_v12, 16  ;;  %v629_v52 = vadd.s32 %v627_v56, %v625_v40 }
  0x6e   : > { %v1824_v10 = vadd.s32 %v608_v55, %v599_v53  ;;  %v1826_v20 = vadd.s32 %v624_v50, %v620_v31  ;;  %v698_v51 = vshrl.u32 %v697_v63, 23  ;;  %v351_v62 = vxor.u32 2147483648, %v350_v45 }
  0x6f   : > { %v500_v1 = vshll.u32 %v499_v29, 23  ;;  %v497_v57 = vor.u32 %v496_v58, %v495_v46  ;;  %v630_v60 = vadd.s32 %v629_v52, %v619_v28  ;;  %v632_v49 = vmul.u32 %v1785_v17, %v578_v18 }
  0x70   : > { %v1176_v61 = vadd.s32 4294967169, %v698_v51  ;;  %vm634_vm1 = vc.u32 %v1824_v10, %v1826_v20  ;;  %vm231_vm2 = vcmp.lt.s32.totalorder %v1572_v2, 0  ;;  %vm1834_vm4 = vcmp.le.f32.partialorder %v229_v5, 0.7853982 }
  0x71   : > { %v501_v59 = vor.u32 4788187, %v500_v1  ;;  %v631_v0 = vadd.s32 %v630_v60, %v621_v19  ;;  %v504_v27 = vcvt.s32.f32 %v497_v57  ;;  %v352_v17 = vsel %vm231_vm2, %v351_v62, %v350_v45 }
  0x72   : > { %v704_v13 = vadd.s32 1, %v1176_v61  ;;  %v694_v26 = vand.u32 2147483647, %v1810_v42  ;;  %v1844_v25 = vsel %vm1834_vm4, %v1572_v2, %v352_v17  ;;  %vm386_vm5 = vcmp.lt.s32.totalorder %v1574_v3, 0 }
  0x73   : > { %v502_v11 = vand.u32 2147483647, %v501_v59  ;;  %v635_v21 = vadd.s32 1, %v631_v0  ;;  %v1868_v50 = vmul.f32 %v1844_v25, %v1844_v25  ;;  %vm1872_vm6 = vcmp.le.f32.partialorder %v384_v7, 0.7853982 }
  0x74   : > { %vm705_vm3 = vcmp.gt.s32.totalorder %v704_v13, 0  ;;  %v701_v43 = vand.u32 8388607, %v694_v26 }
  0x75   : > { %v636_v14 = vsel %vm634_vm1, %v635_v21, %v631_v0  ;;  %v706_v15 = vsel %vm705_vm3, %v704_v13, 0  ;;  %v505_v16 = vmul.f32 %v504_v27, %v502_v11  ;;  %v365_v45 = vmul.f32 -0.00019511016, %v1868_v50 }
  0x76   : > { %v637_v23 = vadd.s32 %v636_v14, %v632_v49  ;;  %v708_v9 = vand.u32 31, %v706_v15  ;;  %v1861_v46 = vshrl.u32 %v706_v15, 5  ;;  %v702_v55 = vor.u32 8388608, %v701_v43 }
  0x77   : > { %v506_v29 = vxor.u32 2147483648, %v505_v16  ;;  %v358_v61 = vmul.f32 -0.001358992, %v1868_v50  ;;  %v366_v0 = vadd.f32 0.008332121, %v365_v45 }
  0x78   : > { %v638_v24 = vadd.s32 536870912, %v637_v23  ;;  %v1847_v5 = vsub.s32 32, %v708_v9  ;;  %v711_v44 = vshll.u32 %v1477_v30, %v708_v9  ;;  %v714_v31 = vshll.u32 %v1478_v32, %v708_v9 }
  0x79   : > { %v720_v33 = vshll.u32 %v1480_v36, %v708_v9  ;;  %v717_v58 = vshll.u32 %v1479_v34, %v708_v9  ;;  %v507_v53 = vsel %vm386_vm5, %v506_v29, %v505_v16  ;;  %v723_v18 = vshll.u32 %v1481_v38, %v708_v9 }
  0x7a   : > { %v1849_v37 = vshrl.u32 %v638_v24, 30  ;;  %v712_v22 = vshrl.u32 %v1478_v32, %v1847_v5  ;;  %v715_v39 = vshrl.u32 %v1479_v34, %v1847_v5  ;;  %v718_v35 = vshrl.u32 %v1480_v36, %v1847_v5 }
  0x7b   : > { %v721_v1 = vshrl.u32 %v1481_v38, %v1847_v5  ;;  %v724_v7 = vshrl.u32 %v1482_v47, %v1847_v5  ;;  %vm726_vm8 = vcmp.lt.s32.totalorder %v1861_v46, 1  ;;  %vm728_vm9 = vcmp.lt.s32.totalorder %v1861_v46, 3 }
  0x7c   : > { %v640_v41 = vshll.u32 %v1849_v37, 30  ;;  %v1882_v36 = vor.u32 %v712_v22, %v711_v44  ;;  %v1884_v40 = vor.u32 %v715_v39, %v714_v31  ;;  %v719_v63 = vor.u32 %v718_v35, %v717_v58 }
  0x7d   : > { %v722_v28 = vor.u32 %v721_v1, %v720_v33  ;;  %vm729_vm10 = vcmp.lt.s32.totalorder %v1861_v46, 4  ;;  %v1898_v38 = vsel %vm1872_vm6, %v1574_v3, %v507_v53  ;;  %v725_v57 = vor.u32 %v724_v7, %v723_v18 }
  0x7e   : > { %v1880_v34 = vsub.s32 %v637_v23, %v640_v41  ;;  %v1901_v19 = vshll.u32 %v702_v55, 8  ;;  %vm727_vm11 = vcmp.lt.s32.totalorder %v1861_v46, 2  ;;  %v734_v59 = vsel %vm726_vm8, %v1882_v36, %v1884_v40 }
  0x7f   : > { %v735_v51 = vsel %vm729_vm10, %v722_v28, 920167782  ;;  %v1915_v49 = vmul.f32 %v1898_v38, %v1898_v38  ;;  %v738_v27 = vsel %vm726_vm8, %v1884_v40, %v719_v63  ;;  %v739_v13 = vsel %vm729_vm10, %v725_v57, 1326507024 }
  0x80   : > { %vm642_vm7 = vcmp.lt.s32.totalorder %v1880_v34, 0  ;;  %v643_v56 = vsub.s32 0, %v1880_v34  ;;  %v736_v60 = vsel %vm728_vm9, %v719_v63, %v735_v51  ;;  %v743_v21 = vand.u32 65535, %v1901_v19 }
  0x81   : > { %v737_v11 = vsel %vm727_vm11, %v734_v59, %v736_v60  ;;  %v744_v14 = vshrl.u32 %v1901_v19, 16  ;;  %v740_v17 = vsel %vm728_vm9, %v722_v28, %v739_v13  ;;  %v633_v9 = vadd.s32 %v1826_v20, %v1824_v10 }
  0x82   : > { %v644_v47 = vsel %vm642_vm7, %v643_v56, %v1880_v34  ;;  %v767_v16 = vand.u32 65535, %v737_v11  ;;  %v768_v23 = vshrl.u32 %v737_v11, 16  ;;  %v741_v43 = vsel %vm727_vm11, %v738_v27, %v740_v17 }
  0x83   : > { %v645_v52 = vclz %v644_v47  ;;  %v353_v44 = vsub.s32 4, %v1716_v6  ;;  %v359_v22 = vadd.f32 0.041655596, %v358_v61  ;;  %v513_v31 = vmul.f32 -0.001358992, %v1915_v49 }
  0x84   : > { %v745_v39 = vand.u32 65535, %v741_v43  ;;  %v367_v33 = vmul.f32 %v366_v0, %v1868_v50  ;;  %v520_v41 = vmul.f32 -0.00019511016, %v1915_v49  ;;  %v746_v35 = vshrl.u32 %v741_v43, 16 }
  0x85   : > { %v1174_v62 = vadd.s32 4294967294, %v645_v52  ;;  %v769_v53 = vmul.u32 %v767_v16, %v743_v21  ;;  %v770_v10 = vmul.u32 %v768_v23, %v743_v21  ;;  %v771_v20 = vmul.u32 %v767_v16, %v744_v14 }
  0x86   : > { %v749_v1 = vmul.u32 %v745_v39, %v744_v14  ;;  %v747_v18 = vmul.u32 %v745_v39, %v743_v21  ;;  %v748_v7 = vmul.u32 %v746_v35, %v743_v21  ;;  %v514_v56 = vadd.f32 0.041655596, %v513_v31 }
  0x87   : > { %vm1175_vm12 = vcmp.lt.s32.totalorder %v1174_v62, 0  ;;  %v772_v47 = vmul.u32 %v768_v23, %v744_v14  ;;  %v773_v57 = vshll.u32 %v770_v10, 16  ;;  %v521_v52 = vadd.f32 0.008332121, %v520_v41 }
  0x88   : > { %v648_v15 = vsel %vm1175_vm12, 0, %v1174_v62  ;;  %v750_v59 = vmul.u32 %v746_v35, %v744_v14  ;;  %v751_v51 = vshll.u32 %v748_v7, 16  ;;  %v753_v60 = vshll.u32 %v749_v1, 16 }
  0x89   : > { %v649_v24 = vsub.s32 32, %v648_v15  ;;  %v653_v29 = vsub.s32 4294967266, %v648_v15  ;;  %v650_v55 = vshll.u32 %v1880_v34, %v648_v15  ;;  %v710_v61 = vshrl.u32 %v1477_v30, %v1847_v5 }
  0x8a   : > { %v731_v62 = vsel %vm729_vm10, %v719_v63, 2102212464  ;;  %v775_v0 = vshll.u32 %v771_v20, 16  ;;  %vm777_vm13 = vc.u32 %v769_v53, %v773_v57  ;;  %vm755_vm14 = vc.u32 %v747_v18, %v751_v51 }
  0x8b   : > { %v654_v58 = vadd.s32 127, %v653_v29  ;;  %v651_v28 = vshrl.u32 %v633_v9, %v649_v24  ;;  %v757_v11 = vadd.s32 %v751_v51, %v747_v18  ;;  %v778_v27 = vsel %vm777_vm13, 1, %v1483_v54 }
  0x8c   : > { %v756_v21 = vsel %vm755_vm14, 1, %v1483_v54  ;;  %v779_v15 = vadd.s32 %v773_v57, %v769_v53  ;;  %v780_v14 = vadd.s32 %v778_v27, %v772_v47  ;;  %v522_v17 = vmul.f32 %v521_v52, %v1915_v49 }
  0x8d   : > { %v655_v45 = vshll.u32 %v654_v58, 23  ;;  %v652_v34 = vor.u32 %v651_v28, %v650_v55  ;;  %v752_v16 = vshrl.u32 %v748_v7, 16  ;;  %v758_v23 = vadd.s32 %v756_v21, %v750_v59 }
  0x8e   : > { %vm759_vm15 = vc.u32 %v757_v11, %v753_v60  ;;  %v730_v30 = vsel %vm726_vm8, %v710_v61, %v1882_v36  ;;  %v774_v63 = vshrl.u32 %v770_v10, 16  ;;  %vm781_vm0 = vc.u32 %v779_v15, %v775_v0 }
  0x8f   : > { %v656_v13 = vor.u32 4788187, %v655_v45  ;;  %v760_v5 = vsel %vm759_vm15, 1, %v1483_v54  ;;  %v732_v9 = vsel %vm728_vm9, %v1884_v40, %v731_v62  ;;  %v754_v24 = vshrl.u32 %v749_v1, 16 }
  0x90   : > { %v762_v29 = vadd.s32 %v760_v5, %v758_v23  ;;  %v782_v43 = vsel %vm781_vm0, 1, %v1483_v54  ;;  %v659_v39 = vcvt.s32.f32 %v652_v34  ;;  %v776_v41 = vshrl.u32 %v771_v20, 16 }
  0x91   : > { %v657_v31 = vand.u32 2147483647, %v656_v13  ;;  %v784_v58 = vadd.s32 %v782_v43, %v780_v14  ;;  %v354_v36 = vsel %vm231_vm2, %v353_v44, %v1716_v6  ;;  %v508_v35 = vsub.s32 4, %v1761_v8 }
  0x92   : > { %v763_v53 = vadd.s32 %v762_v29, %v752_v16  ;;  %v1956_v10 = vadd.s32 %v779_v15, %v775_v0  ;;  %v360_v55 = vmul.f32 %v359_v22, %v1868_v50  ;;  %v368_v40 = vadd.f32 -0.16666654, %v367_v33 }
  0x93   : > { %v733_v1 = vsel %vm727_vm11, %v730_v30, %v732_v9  ;;  %v785_v54 = vadd.s32 %v784_v58, %v774_v63  ;;  %v515_v28 = vmul.f32 %v514_v56, %v1915_v49  ;;  %v523_v20 = vadd.f32 -0.16666654, %v522_v17 }
  0x94   : > { %v1962_v18 = vadd.s32 %v763_v53, %v754_v24  ;;  %v660_v7 = vmul.f32 %v659_v39, %v657_v31  ;;  %v356_v6 = vsel %vm1834_vm4, 0, %v354_v36  ;;  %v787_v44 = vmul.u32 %v1901_v19, %v733_v1  ;;  %v857_v36 = vld [vmem:[%s2125_s1 + $0x8] sm:$0xf] }
  0x95   : > { %v786_v45 = vadd.s32 %v785_v54, %v776_v41  ;;  %v361_v22 = vadd.f32 -0.4999988, %v360_v55  ;;  %v369_v46 = vmul.f32 %v368_v40, %v1868_v50  ;;  %v509_v33 = vsel %vm386_vm5, %v508_v35, %v1761_v8 }
  0x96   : > { %vm789_vm1 = vc.u32 %v1962_v18, %v1956_v10  ;;  %v516_v47 = vadd.f32 -0.4999988, %v515_v28  ;;  %v524_v57 = vmul.f32 %v523_v20, %v1915_v49  ;;  %v661_v52 = vxor.u32 2147483648, %v660_v7 }
  0x97   : > { %v790_v56 = vadd.s32 1, %v786_v45  ;;  %v373_v12 = vadd.s32 3, %v356_v6  ;;  %v511_v19 = vsel %vm1872_vm6, 0, %v509_v33  ;;  %vm541_vm2 = vcmp.lt.s32.totalorder %v1577_v4, 0 }
  0x98   : > { %v362_v60 = vmul.f32 %v361_v22, %v1868_v50  ;;  %v370_v61 = vadd.f32 1.0, %v369_v46  ;;  %v517_v62 = vmul.f32 %v516_v47, %v1915_v49  ;;  %v525_v0 = vadd.f32 1.0, %v524_v57 }
  0x99   : > { %v791_v59 = vsel %vm789_vm1, %v790_v56, %v786_v45  ;;  %v528_v34 = vadd.s32 3, %v511_v19  ;;  %vm1981_vm3 = vcmp.le.f32.partialorder %v539_v48, 0.7853982  ;;  %v662_v32 = vsel %vm541_vm2, %v661_v52, %v660_v7 }
  0x9a   : > { %v792_v51 = vadd.s32 %v791_v59, %v787_v44  ;;  %v374_v27 = vand.u32 3, %v373_v12  ;;  %v363_v21 = vadd.f32 1.0, %v362_v60  ;;  %v371_v50 = vmul.f32 %v370_v61, %v1844_v25  ;;  %v1202_v12 = vld [vmem:[%s2125_s1] sm:$0xff] }
  0x9b   : > { %v518_v15 = vadd.f32 1.0, %v517_v62  ;;  %v526_v49 = vmul.f32 %v525_v0, %v1898_v38  ;;  %v1994_v14 = vsel %vm1981_vm3, %v1577_v4, %v662_v32  ;;  %v529_v17 = vand.u32 3, %v528_v34 }
  0x9c   : > { %v793_v8 = vadd.s32 536870912, %v792_v51  ;;  %vm376_vm4 = vcmp.eq.s32.totalorder %v374_v27, 0  ;;  %v377_v23 = vxor.u32 2147483648, %v371_v50  ;;  %vm379_vm5 = vcmp.eq.s32.totalorder %v374_v27, 2 }
  0x9d   : > { %v380_v30 = vxor.u32 2147483648, %v363_v21  ;;  %v1999_v5 = vmul.f32 %v1994_v14, %v1994_v14  ;;  %v532_v25 = vxor.u32 2147483648, %v526_v49  ;;  %v535_v63 = vxor.u32 2147483648, %v518_v15 }
  0x9e   : > { %v1987_v13 = vshrl.u32 %v793_v8, 30  ;;  %vm531_vm7 = vcmp.eq.s32.totalorder %v529_v17, 0  ;;  %vm534_vm8 = vcmp.eq.s32.totalorder %v529_v17, 2  ;;  %vm375_vm9 = vcmp.lt.s32.totalorder %v374_v27, 2 }
  0x9f   : > { %v378_v24 = vsel %vm376_vm4, %v363_v21, %v377_v23  ;;  %v381_v29 = vsel %vm379_vm5, %v380_v30, %v371_v50  ;;  %v675_v43 = vmul.f32 -0.00019511016, %v1999_v5  ;;  %vm530_vm10 = vcmp.lt.s32.totalorder %v529_v17, 2 }
  0xa0   : > { %v795_v48 = vshll.u32 %v1987_v13, 30  ;;  %v533_v39 = vsel %vm531_vm7, %v518_v15, %v532_v25  ;;  %v536_v41 = vsel %vm534_vm8, %v535_v63, %v526_v49  ;;  %vm372_vm11 = vweird.f32 %v1572_v2 }
  0xa1   : > { %v382_v35 = vsel %vm375_vm9, %v378_v24, %v381_v29  ;;  %vm527_vm12 = vweird.f32 %v1574_v3  ;;  %v668_v53 = vmul.f32 -0.001358992, %v1999_v5  ;;  %v867_v55 = vunpack.c.l.b16 %v857_v36 }
  0xa2   : > { %v796_v16 = vsub.s32 %v792_v51, %v795_v48  ;;  %v537_v40 = vsel %vm530_vm10, %v533_v39, %v536_v41  ;;  %v676_v1 = vadd.f32 0.008332121, %v675_v43  ;;  %v788_v54 = vadd.s32 %v1956_v10, %v1962_v18 }
  0xa3   : > { %v869_v20 = vpack.c.b16 %v867_v55, %v867_v55  ;;  %vm878_vm14 = vcmask 1043456   ;;  %v383_v44 = vsel %vm372_vm11, nan, %v382_v35  ;;  %v538_v22 = vsel %vm527_vm12, nan, %v537_v40 }
  0xa4   : > { %vm797_vm6 = vcmp.lt.s32.totalorder %v796_v16, 0  ;;  %v798_v38 = vsub.s32 0, %v796_v16  ;;  %v669_v46 = vadd.f32 0.041655596, %v668_v53  ;;  %v677_v56 = vmul.f32 %v676_v1, %v1999_v5 }
  0xa5   : > { %v880_v33 = vsel %vm878_vm14, %v869_v20, 0  ;;  %v849_v52 = vadd.f32 %v1572_v2, %v383_v44  ;;  %v850_v59 = vadd.f32 %v1574_v3, %v538_v22  ;;  %v663_v19 = vsub.s32 4, %v1849_v37 }
  0xa6   : > { %v799_v9 = vsel %vm797_vm6, %v798_v38, %v796_v16  ;;  %888 = vmatpush.bf16.msra.mxu0 %v880_v33  ;;  %1225 = vmatpush.bf16.msra.mxu1 %v880_v33  ;;  %v670_v51 = vmul.f32 %v669_v46, %v1999_v5  ;;  %v678_v60 = vadd.f32 -0.16666654, %v677_v56  ;;  %vm871_vm15 = vcmask 195584  }
  0xa7   : > { %v800_v31 = vclz %v799_v9  ;;  %v853_v0 = vpack.c.bf16 %v850_v59, %v849_v52  ;;  %v664_v2 = vsel %vm541_vm2, %v663_v19, %v1849_v37  ;;  %vm696_vm0 = vcmp.lt.s32.totalorder %v1810_v42, 0 }
  0xa8   : > { %v671_v3 = vadd.f32 -0.4999988, %v670_v51  ;;  %v679_v34 = vmul.f32 %v678_v60, %v1999_v5  ;;  %v818_v27 = vsub.s32 4, %v1987_v13  ;;  %v666_v21 = vsel %vm1981_vm3, 0, %v664_v2 }
  0xa9   : > { %v1177_v58 = vadd.s32 4294967294, %v800_v31  ;;  %vm2031_vm1 = vcmp.le.f32.partialorder %v694_v26, 0.7853982  ;;  %v683_v17 = vadd.s32 3, %v666_v21  ;;  %vm682_vm5 = vweird.f32 %v1577_v4 }
  0xaa   : > { %889 = vmatpush.bf16.msra.mxu0 %v1202_v12  ;;  %1226 = vmatpush.bf16.msra.mxu1 %v1202_v12  ;;  %v672_v15 = vmul.f32 %v671_v3, %v1999_v5  ;;  %v680_v49 = vadd.f32 1.0, %v679_v34  ;;  %vm837_vm9 = vweird.f32 %v1810_v42 }
  0xab   : > { %vm1178_vm13 = vcmp.lt.s32.totalorder %v1177_v58, 0  ;;  %v684_v9 = vand.u32 3, %v683_v17 }
  0xac   : > { %v803_v28 = vsel %vm1178_vm13, 0, %v1177_v58  ;;  %v673_v30 = vadd.f32 1.0, %v672_v15  ;;  %v681_v25 = vmul.f32 %v680_v49, %v1994_v14 }
  0xad   : > { %v804_v7 = vsub.s32 32, %v803_v28  ;;  %v805_v45 = vshll.u32 %v796_v16, %v803_v28  ;;  %v808_v6 = vsub.s32 4294967266, %v803_v28  ;;  %1183 = vmatmul.msk.bf16.vlgmr.msra.gmra.mxu0 %vm871_vm15, %v853_v0  ;;  %v819_v16 = vsel %vm696_vm0, %v818_v27, %v1987_v13 }
  0xae   : > { %v821_v26 = vsel %vm2031_vm1, 0, %v819_v16  ;;  %v687_v43 = vxor.u32 2147483648, %v681_v25  ;;  %v690_v31 = vxor.u32 2147483648, %v673_v30  ;;  %vm686_vm2 = vcmp.eq.s32.totalorder %v684_v9, 0 }
  0xaf   : > { %v806_v47 = vshrl.u32 %v788_v54, %v804_v7  ;;  %v809_v57 = vadd.s32 127, %v808_v6  ;;  %v838_v29 = vadd.s32 3, %v821_v26  ;;  %vm689_vm3 = vcmp.eq.s32.totalorder %v684_v9, 2 }
  0xb0   : > { %vm685_vm4 = vcmp.lt.s32.totalorder %v684_v9, 2  ;;  %v688_v14 = vsel %vm686_vm2, %v673_v30, %v687_v43  ;;  %v691_v35 = vsel %vm689_vm3, %v690_v31, %v681_v25 }
  0xb1   : > { %v807_v10 = vor.u32 %v806_v47, %v805_v45  ;;  %v810_v18 = vshll.u32 %v809_v57, 23  ;;  %v839_v36 = vand.u32 3, %v838_v29  ;;  %v692_v54 = vsel %vm685_vm4, %v688_v14, %v691_v35 }
  0xb2   : > { %v693_v7 = vsel %vm682_vm5, nan, %v692_v54 }
  0xb3   : > { %v811_v61 = vor.u32 4788187, %v810_v18  ;;  %v814_v62 = vcvt.s32.f32 %v807_v10  ;;  %vm844_vm6 = vcmp.eq.s32.totalorder %v839_v36, 2  ;;  %vm841_vm7 = vcmp.eq.s32.totalorder %v839_v36, 0  ;;  %v1356_v10 = vld [vmem:[%s2126_s2] ss:$0 sm:$0xff] }
  0xb4   : > { %vm840_vm8 = vcmp.lt.s32.totalorder %v839_v36, 2  ;;  %v851_v46 = vadd.f32 %v1577_v4, %v693_v7 }
  0xb5   : > { %v812_v8 = vand.u32 2147483647, %v811_v61 }
  0xb7   : > { %v815_v32 = vmul.f32 %v814_v62, %v812_v8 }
  0xb9   : > { %v816_v37 = vxor.u32 2147483648, %v815_v32 }
  0xbb   : > { %v817_v48 = vsel %vm696_vm0, %v816_v37, %v815_v32 }
  0xbc   : > { %v820_v23 = vsel %vm2031_vm1, %v1810_v42, %v817_v48 }
  0xbd   : > { %v822_v11 = vmul.f32 %v820_v23, %v820_v23 }
  0xbf   : > { %v823_v63 = vmul.f32 -0.001358992, %v822_v11  ;;  %v830_v38 = vmul.f32 -0.00019511016, %v822_v11 }
  0xc1   : > { %v824_v5 = vadd.f32 0.041655596, %v823_v63  ;;  %v831_v24 = vadd.f32 0.008332121, %v830_v38 }
  0xc3   : > { %v825_v13 = vmul.f32 %v824_v5, %v822_v11  ;;  %v832_v39 = vmul.f32 %v831_v24, %v822_v11 }
  0xc5   : > { %v826_v41 = vadd.f32 -0.4999988, %v825_v13  ;;  %v833_v58 = vadd.f32 -0.16666654, %v832_v39 }
  0xc7   : > { %v827_v53 = vmul.f32 %v826_v41, %v822_v11  ;;  %v834_v55 = vmul.f32 %v833_v58, %v822_v11 }
  0xc9   : > { %v828_v40 = vadd.f32 1.0, %v827_v53  ;;  %v835_v1 = vadd.f32 1.0, %v834_v55 }
  0xcb   : > { %v836_v28 = vmul.f32 %v835_v1, %v820_v23  ;;  %v845_v20 = vxor.u32 2147483648, %v828_v40 }
  0xcd   : > { %v842_v45 = vxor.u32 2147483648, %v836_v28  ;;  %v846_v6 = vsel %vm844_vm6, %v845_v20, %v836_v28 }
  0xcf   : > { %v843_v44 = vsel %vm841_vm7, %v828_v40, %v842_v45 }
  0xd0   : > { %v847_v22 = vsel %vm840_vm8, %v843_v44, %v846_v6 }
  0xd1   : > { %v848_v33 = vsel %vm837_vm9, nan, %v847_v22 }
  0xd2   : > { %v852_v56 = vadd.f32 %v1810_v42, %v848_v33 }
  0xd4   : > { %v854_v47 = vpack.c.bf16 %v852_v56, %v851_v46 }
  0xd6   : > { %1184 = vmatmul.msk.bf16.vlgmr.msra.gmra.mxu1 %vm871_vm15, %v854_v47 }
 0x12a   : > { %v891_v57 = vpop.f32.mrf.mxu0 }
 0x12b   : > { %v892_v52 = vadd.f32 %v1356_v10, %v891_v57 }
 0x132   : > { %v893_v18 = vpop.f32.mrf.mxu0 }
 0x133   : > { %v894_v59 = vadd.f32 %v1356_v10, %v893_v18 }
 0x135   : > { %v1216_v12 = vpack.c.bf16 %v894_v59, %v892_v52 }
 0x137   : > { %1217 = vst [vmem:[%s2052_s29] sm:$0xff] %v1216_v12  }
 0x153   : > { %v896_v4 = vpop.f32.mrf.mxu1 }
 0x154   : > { %v897_v19 = vadd.f32 %v1356_v10, %v896_v4 }
 0x15b   : > { %v898_v42 = vpop.f32.mrf.mxu1 }
 0x15c   : > { %v899_v51 = vadd.f32 %v1356_v10, %v898_v42  ;;  %915 = sbr.rel (!%p1548_p5) target bundleno = 393 (0x189), region = 36 }
 0x15e   : > { %v1221_v60 = vpack.c.bf16 %v899_v51, %v897_v19 }
 0x160   : > { %1224 = vst [vmem:[%s2052_s29 + $0x8] sm:$0xff] %v1221_v60  }
 0x161   : > { %s2153_s12 = smov (!%p918_p11, %s917_s12), 4 }
 0x162   : > { %s1187_s6 = sshll.u32 %s2153_s12, 2 }
 0x163   : > { %p1190_p12 = scmp.eq.s32.totalorder %s1187_s6, 0 }
 0x164   : > { %s2070_s23 = sshrl.u32 (!%p1190_p12), %s2153_s12, 2 }
 0x165   : > { %928 = sbr.rel (%p1190_p12) target bundleno = 393 (0x189), region = 40  ;;  %p1191_p13 = scmp.le.s32.totalorder (!%p1190_p12), %s2070_s23, 0 }
 0x16a   : > { %1104 = sbr.rel (%p1191_p13) target bundleno = 376 (0x178), region = 112  ;;  %s2137_s15 = smov (!%p1191_p13), %s2067_s9 }
 0x16b   : > { %s2138_s28 = smov (!%p1191_p13), %s2052_s29  ;;  %s2079_s10 = smov (!%p1191_p13), 0  }
 0x16c   : > { %s1457_s11 = smov (!%p1191_p13), 0  }
 0x16f LB: >> { %v945_v61 = vld [vmem:[%s1451_s28] sm:$0xf]  ;;  %v947_v62 = vld [vmem:[%s1451_s28 + $0x4] sm:$0xf]  ;;  %v949_v0 = vld [vmem:[%s1451_s28 + $0x8] sm:$0xf]  ;;  %s1459_s11 = sphi %s1457_s11, %s939_s11   ;;  %s1455_s10 = sphi %s2079_s10, %s2139_s10   ;;  %s1451_s28 = sphi %s2138_s28, %s958_s28   ;;  %s1447_s15 = sphi %s2137_s15, %s959_s15  }
 0x170   : >> { %946 = vst [vmem:[%s1447_s15] sm:$0xf] %v945_v61  ;;  %v951_v8 = vld [vmem:[%s1451_s28 + $0xc] sm:$0xf]  ;;  %s953_s14 = sadd.s32 1, %s1455_s10  ;;  %s939_s11 = sadd.s32 1, %s1459_s11  }
 0x171   : >> { %948 = vst [vmem:[%s1447_s15 + $0x4] sm:$0xf] %v947_v62  ;;  %p954_p0 = scmp.ge.s32.totalorder %s953_s14, %s2070_s23  ;;  %p938_p1 = scmp.ge.s32.totalorder %s939_s11, %s2070_s23 }
 0x172   : >> { %950 = vst [vmem:[%s1447_s15 + $0x8] sm:$0xf] %v949_v0 }
 0x173   : >> { %952 = vst [vmem:[%s1447_s15 + $0xc] sm:$0xf] %v951_v8  ;;  %s2155_s14 = smov (%p954_p0, %s953_s14), 0  ;;  %941 = sbr.rel (!%p938_p1) target bundleno = 367 (0x16f), region = 118 }
 0x174   : >> { %s1192_s21 = sshll.u32 %s2155_s14, 4  ;;  %s2139_s10 = smov %s2155_s14 }
 0x175   : >> { %s958_s28 = scalar_lea.vmem %s2052_s29, %s1192_s21 [#allocation2]   ;;  %s959_s15 = scalar_lea.vmem %s2067_s9, %s1192_s21  }
 0x178 PF: > { %s2095_s22 = sand.u32 3, %s2153_s12   ;;  %s1203_s24 = sshll.u32 %s2070_s23, 4 }
 0x179   : > { %s964_s25 = scalar_lea.vmem %s2052_s29, %s1203_s24 [#allocation2]   ;;  %s966_s26 = scalar_lea.vmem %s2067_s9, %s1203_s24  }
 0x17a   : > { %p1197_p2 = scmp.le.s32.totalorder %s2095_s22, 0 }
 0x17b   : > { %s1461_s30 = smov (!%p1197_p2), %s966_s26   ;;  %s1465_s4 = smov (!%p1197_p2), %s964_s25  }
 0x17c   : > { %1118 = sbr.rel (%p1197_p2) target bundleno = 393 (0x189), region = 123  ;;  %s1469_s5 = smov (!%p1197_p2), 0  }
 0x17d   : > { %s1473_s6 = smov (!%p1197_p2), 0  }
 0x181 LB: >> { %v976_v2 = vld [vmem:[%s1467_s4] sm:$0xf]  ;;  %s978_s12 = sadd.s32 1, %s1471_s5  ;;  %s970_s6 = sadd.s32 1, %s1475_s6   ;;  %s1475_s6 = sphi %s1473_s6, %s970_s6   ;;  %s1471_s5 = sphi %s1469_s5, %s1470_s5   ;;  %s1467_s4 = sphi %s1465_s4, %s983_s4   ;;  %s1463_s30 = sphi %s1461_s30, %s984_s30  }
 0x182   : >> { %977 = vst [vmem:[%s1463_s30] sm:$0xf] %v976_v2  ;;  %p979_p3 = scmp.ge.s32.totalorder %s978_s12, %s2095_s22  ;;  %p969_p4 = scmp.ge.s32.totalorder %s970_s6, %s2095_s22 }
 0x184   : >> { %s2157_s12 = smov (%p979_p3, %s978_s12), 0  ;;  %972 = sbr.rel (!%p969_p4) target bundleno = 385 (0x181), region = 129 }
 0x185   : >> { %s1198_s29 = sshll.u32 %s2157_s12, 2  ;;  %s1470_s5 = smov %s2157_s12  }
 0x186   : >> { %s983_s4 = scalar_lea.vmem %s964_s25, %s1198_s29 [#allocation2]   ;;  %s984_s30 = scalar_lea.vmem %s966_s26, %s1198_s29  }
 0x189 PF: > { %s13_s18 = sadd.s32 1, %s1443_s18   ;;  %s2140_s12 = smov %s1423_s13 }
 0x18a   : > { %p10_p5 = scmp.ge.s32.totalorder %s13_s18, 8   ;;  %s2141_s13 = smov %s1559_s27 }
 0x18b   : > { %s2142_s14 = smov %s1435_s16  ;;  %s2143_s15 = smov %s1439_s17 }
 0x18c   : > { %s2144_s16 = smov %s2147_s19  ;;  %s2145_s17 = smov %s2151_s20 }
 0x18d   :  { %12 = sbr.rel (!%p10_p5) target bundleno = 4 (0x4), region = 140 }

</bundles_post_ra>
